<compile_context>
chip_gen: v7x
topology: tpu7x:2x2x1
jax: 0.10.0
libtpu: 0.0.40
codegen_flags: <defaults>
</compile_context>

<pallas_src>
import jax
import jax.numpy as jnp
from jax import lax
from jax.experimental import pallas as pl
from jax.experimental.pallas import tpu as pltpu

PATCH_SIZE = 16


def _round_up(x, m):
    return ((x + m - 1) // m) * m


def _pick_tile_m(M, cap=1024):
    """Largest tm <= cap that is a multiple of 8 and divides M (rounded up to
    a multiple of 8), preferring >= 2 grid steps (megacore).  Returns
    (tm, M_pad)."""
    M_pad = _round_up(max(M, 8), 8)
    cap = max(8, min(cap, M_pad))
    cap -= cap % 8
    single_tile = None
    for tm in range(cap, 7, -8):
        if M_pad % tm == 0:
            if M_pad // tm >= 2:
                return tm, M_pad
            if single_tile is None:
                single_tile = tm
    return (single_tile if single_tile is not None else 8), M_pad


def _patch_embed_kernel(p_ref, w_ref, b_ref, o_ref):
    # p_ref: (tm, K) bf16 patches; w_ref: (K, E) bf16 weight; b_ref: (1, E) f32.
    acc = jnp.dot(p_ref[...], w_ref[...], preferred_element_type=jnp.float32)
    o_ref[...] = (acc + b_ref[...]).astype(o_ref.dtype)


def patch_embedding(x, weight, bias, patch_size=PATCH_SIZE, out_dtype=None):
    """x: (B, C, H, W); weight: (E, C, P, P); bias: (E,) -> (B, num_patches, E)."""
    B, C, H, W = x.shape
    E = weight.shape[0]
    assert H % patch_size == 0 and W % patch_size == 0, (
        f"Input image size must be divisible by patch size, image shape: {W}, "
        f"patch size: {patch_size}")
    gh, gw = H // patch_size, W // patch_size
    K = C * patch_size * patch_size
    M = B * gh * gw
    out_dtype = x.dtype if out_dtype is None else out_dtype
    compute_dtype = jnp.bfloat16

    # -- patch extraction (transpose-only producer; candidate for input fusion) --
    xp = x.reshape(B, C, gh, patch_size, gw, patch_size)
    xp = xp.transpose(0, 2, 4, 1, 3, 5)                 # (B, gh, gw, C, P, P)
    patches = xp.reshape(M, K).astype(compute_dtype)    # (M, K) bf16

    # One-time XLA transpose of the small weight -> canonical (K, E) MXU RHS.
    wmat = weight.reshape(E, K).T.astype(compute_dtype)  # (K, E) bf16
    bmat = bias.reshape(1, E).astype(jnp.float32)        # f32 bias add in-kernel

    tm, M_pad = _pick_tile_m(M)
    if M_pad != M:
        # Rare (M not a multiple of 8).  Full-copy pad; acceptable because it
        # only triggers for odd grid sizes, and padded rows are sliced off.
        patches = jnp.pad(patches, ((0, M_pad - M), (0, 0)))

    out_itemsize = jnp.dtype(out_dtype).itemsize
    vmem_needed = (2 * tm * K * 2                 # double-buffered bf16 patches
                   + K * E * 2                    # single-buffered bf16 weight
                   + 8 * max(E, 128) * 4          # bias tile (padded)
                   + 2 * tm * E * out_itemsize    # double-buffered output
                   + tm * E * 4)                  # f32 accumulator temp
    # >= default scoped VMEM (safe everywhere), bump if the tile needs more,
    # never above v7x's 64 MiB per-TC physical VMEM.
    vmem_limit = min(max(int(vmem_needed * 1.5) + (2 << 20), 32 << 20), 64 << 20)

    cost = pl.CostEstimate(
        flops=2 * M_pad * K * E,
        transcendentals=0,
        bytes_accessed=(M_pad * K * 2 + K * E * 2 + E * 4
                        + M_pad * E * out_itemsize))

    out = pl.pallas_call(
        _patch_embed_kernel,
        out_shape=jax.ShapeDtypeStruct((M_pad, E), out_dtype),
        grid_spec=pltpu.PrefetchScalarGridSpec(
            num_scalar_prefetch=0,
            grid=(M_pad // tm,),
            in_specs=[
                pl.BlockSpec((tm, K), lambda i: (i, 0)),
                # constant index_map -> DMA'd once; single buffer saves VMEM
                pl.BlockSpec((K, E), lambda i: (0, 0),
                             pipeline_mode=pl.Buffered(1)),
                pl.BlockSpec((1, E), lambda i: (0, 0),
                             pipeline_mode=pl.Buffered(1)),
            ],
            out_specs=pl.BlockSpec((tm, E), lambda i: (i, 0)),
        ),
        compiler_params=pltpu.CompilerParams(
            dimension_semantics=("parallel",),
            vmem_limit_bytes=vmem_limit,
            allow_input_fusion=[0],
        ),
        cost_estimate=cost,
    )(patches, wmat, bmat)

    return out[:M].reshape(B, gh * gw, E)
    # TODO(synk): for very large K (= C*P*P) add a K grid axis ("arbitrary")
    # with an f32 VMEM accumulator instead of loading the full K per step.


if __name__ == "__main__":
    # Small shapes consistent with the module: patch_size fixed at 16,
    # so use a 32x32 image -> 2x2 = 4 patches per image.
    B, C, H, W = 2, 3, 32, 32
    E = 128  # embedding_dim (small stand-in for 768)

    key = jax.random.PRNGKey(0)
    kx, kw, kb = jax.random.split(key, 3)
    x = jax.random.normal(kx, (B, C, H, W), dtype=jnp.float32)
    weight = 0.02 * jax.random.normal(kw, (E, C, PATCH_SIZE, PATCH_SIZE),
                                      dtype=jnp.float32)
    bias = 0.01 * jax.random.normal(kb, (E,), dtype=jnp.float32)

    out = patch_embedding(x, weight, bias)
    out = jax.block_until_ready(out)
    assert out.shape == (B, (H // PATCH_SIZE) * (W // PATCH_SIZE), E)

    # pure-JAX reference using the same bf16-input / f32-accumulate recipe
    P = PATCH_SIZE
    xp = x.reshape(B, C, H // P, P, W // P, P)
    xp = xp.transpose(0, 2, 4, 1, 3, 5).reshape(B, -1, C * P * P)
    ref = lax.dot_general(
        xp.astype(jnp.bfloat16),
        weight.reshape(E, -1).astype(jnp.bfloat16),
        dimension_numbers=(((2,), (1,)), ((), ())),
        preferred_element_type=jnp.float32) + bias
    assert jnp.allclose(out, ref.astype(out.dtype), atol=2e-3, rtol=2e-3)

    # sanity check against full-f32 math (loose tolerance for bf16 inputs)
    ref_f32 = jnp.einsum("bnk,ek->bne", xp, weight.reshape(E, -1)) + bias
    assert jnp.allclose(out, ref_f32, atol=5e-2, rtol=5e-2)

    print("KERNEL_OK")
</pallas_src>

<mosaic_0001>
module attributes {stable_mosaic.version = 11 : i64} {
  func.func @_patch_embed_kernel(%arg0: i32, %arg1: memref<8x768xbf16, #tpu.memory_space<vmem>>, %arg2: memref<768x128xbf16, #tpu.memory_space<vmem>>, %arg3: memref<1x128xf32, #tpu.memory_space<vmem>>, %arg4: memref<8x128xf32, #tpu.memory_space<vmem>>) attributes {dimension_semantics = [#tpu.dimension_semantics<parallel>], iteration_bounds = array<i64: 1>, scalar_prefetch = 0 : i64, scratch_operands = 0 : i64, tpu.core_type = #tpu.core_type<tc>, window_params = [{transform_indices = @transform_0, window_bounds = array<i64: 8, 768>}, {pipeline_mode = #tpu.pipeline_mode<synchronous>, transform_indices = @transform_1, window_bounds = array<i64: 768, 128>}, {pipeline_mode = #tpu.pipeline_mode<synchronous>, transform_indices = @transform_2, window_bounds = array<i64: 1, 128>}, {transform_indices = @transform_3, window_bounds = array<i64: 8, 128>}]} {
    %c0 = arith.constant 0 : index
    %c0_0 = arith.constant 0 : index
    %0 = vector.load %arg1[%c0, %c0_0] : memref<8x768xbf16, #tpu.memory_space<vmem>>, vector<8x768xbf16>
    %c0_1 = arith.constant 0 : index
    %c0_2 = arith.constant 0 : index
    %1 = vector.load %arg2[%c0_1, %c0_2] : memref<768x128xbf16, #tpu.memory_space<vmem>>, vector<768x128xbf16>
    %cst = arith.constant dense<0.000000e+00> : vector<8x128xf32>
    %2 = tpu.matmul %0, %1, %cst {dimension_numbers = #tpu.dot_dimension_numbers<[1], [0], [0], [1], [0, 0, 1, 1], [], []>} : vector<8x768xbf16>, vector<768x128xbf16>, vector<8x128xf32> -> vector<8x128xf32>
    %c0_3 = arith.constant 0 : index
    %c0_4 = arith.constant 0 : index
    %3 = vector.load %arg3[%c0_3, %c0_4] : memref<1x128xf32, #tpu.memory_space<vmem>>, vector<1x128xf32>
    %4 = vector.broadcast %3 : vector<1x128xf32> to vector<8x128xf32>
    %5 = arith.addf %2, %4 : vector<8x128xf32>
    %c0_5 = arith.constant 0 : index
    %c0_6 = arith.constant 0 : index
    %6 = vector.load %arg4[%c0_5, %c0_6] : memref<8x128xf32, #tpu.memory_space<vmem>>, vector<8x128xf32>
    tpu.vector_store %arg4[%c0_5, %c0_6], %5 {strides = array<i32>} : memref<8x128xf32, #tpu.memory_space<vmem>>, vector<8x128xf32>,
    return
  }
  func.func @transform_0(%arg0: i32) -> (i32, i32) {
    %c0_i32 = arith.constant 0 : i32
    %c0_i32_0 = arith.constant 0 : i32
    return %arg0, %c0_i32 : i32, i32
  }
  func.func @transform_1(%arg0: i32) -> (i32, i32) {
    %c0_i32 = arith.constant 0 : i32
    %c0_i32_0 = arith.constant 0 : i32
    %c0_i32_1 = arith.constant 0 : i32
    return %c0_i32, %c0_i32_0 : i32, i32
  }
  func.func @transform_2(%arg0: i32) -> (i32, i32) {
    %c0_i32 = arith.constant 0 : i32
    %c0_i32_0 = arith.constant 0 : i32
    %c0_i32_1 = arith.constant 0 : i32
    return %c0_i32, %c0_i32_0 : i32, i32
  }
  func.func @transform_3(%arg0: i32) -> (i32, i32) {
    %c0_i32 = arith.constant 0 : i32
    %c0_i32_0 = arith.constant 0 : i32
    return %arg0, %c0_i32 : i32, i32
  }
}

</mosaic_0001>

<bundles_post_ra>
// kernel: tpu_custom_call.1
= control target key start
LH: loop header
LB: loop body
LE: loop exit
PB: predicated region body
PF: predicated region fallthrough
CT: control target
= control target key end

     0   :  { %8 = vsyncpa [#allocation3], 0  ;;  %s917_s0 = inlined_call_operand.hbm [shape: bf16[8,768], index: 0, kind: input, shape index: {}]   ;;  %s918_s1 = inlined_call_operand.hbm [shape: bf16[768,128], index: 1, kind: input, shape index: {}]   ;;  %s919_s2 = inlined_call_operand.vmem [shape: f32[1,128], index: 2, kind: input, shape index: {}]   ;;  %s920_s3 = inlined_call_operand.hbm [shape: f32[8,128], index: 3, kind: output, shape index: {}]  }
   0x1   :  { %9 = vsyncpa [#allocation6], 0 }
   0x2   :  { %10 = vsyncpa [#allocation4], 0  ;;  %s846_s12 = smov [#allocation2]   ;;  %s847_s14 = smov [#allocation5]  }
   0x3   :  { %s17_s13 = sshll.u32 %s846_s12, 4  ;;  %s26_s15 = sshll.u32 %s847_s14, 4  ;;  %s18_s13 = int_to_ptr.vmem [resolvable:$true] %s17_s13  ;;  %s871_s15 = int_to_ptr.vmem [resolvable:$true] %s26_s15 }
   0x4   :  { %s774_s18 = scalar_lea.hbm %s917_s0, 384 }
   0x5   :  { %p775_p0 = scmp.ne.s32.totalorder %s917_s0, %s774_s18  ;;  %p778_p1 = scmp.lt.u32.totalorder %s774_s18, %s917_s0 }
   0x7   :  { %p780_p2 = pnand %p778_p1, %p775_p0 }
   0x9   :  { %783 = shalt.err (!%p780_p2)
}
   0xa   :  { %s784_s23 = scalar_lea.vmem %s18_s13, 384  ;;  %p789_p4 = scmp.lt.s32.totalorder %s18_s13, %s18_s13 }
   0xb   :  { %p785_p3 = scmp.ne.s32.totalorder %s18_s13, %s784_s23  ;;  %p790_p5 = scmp.lt.s32.totalorder %s784_s23, %s784_s23 }
   0xd   :  { %p791_p6 = por %p790_p5, %p789_p4 }
   0xf   :  { %p792_p7 = pnand %p791_p6, %p785_p3 }
  0x11   :  { %795 = shalt.err (!%p792_p7)
}
  0x12   :  { %20 = dma.hbm_to_vmem [thread:$0]  %s917_s0, 384, %s18_s13, [#allocation3]  }
  0x13   :  { %s796_s28 = scalar_lea.hbm %s918_s1, 6144 }
  0x14   :  { %p797_p8 = scmp.ne.s32.totalorder %s918_s1, %s796_s28  ;;  %p800_p9 = scmp.lt.u32.totalorder %s796_s28, %s918_s1 }
  0x16   :  { %p802_p10 = pnand %p800_p9, %p797_p8 }
  0x18   :  { %805 = shalt.err (!%p802_p10)
}
  0x19   :  { %s806_s6 = scalar_lea.vmem %s871_s15, 6144  ;;  %p811_p12 = scmp.lt.s32.totalorder %s871_s15, %s871_s15 }
  0x1a   :  { %p807_p11 = scmp.ne.s32.totalorder %s871_s15, %s806_s6  ;;  %p812_p13 = scmp.lt.s32.totalorder %s806_s6, %s806_s6 }
  0x1c   :  { %p813_p0 = por %p812_p13, %p811_p12 }
  0x1e   :  { %p814_p1 = pnand %p813_p0, %p807_p11 }
  0x20   :  { %817 = shalt.err (!%p814_p1)
}
  0x21   :  { %s848_s0 = smov 64   ;;  %s849_s7 = smov 4  }
  0x22   :  { %32 = dma.hbm_to_vmem [thread:$0]  %s918_s1, 6144, %s871_s15, [#allocation6], %s848_s0, %s848_s0, %s849_s7  }
  0x23   :  { %840 = dma.done.wait [#allocation3], 384  }
  0x24   :  { %841 = vsyncadd [#allocation3], 4294966912 }
  0x25   :  { %842 = dma.done.wait [#allocation6], 6144  }
  0x26   :  { %843 = vsyncadd [#allocation6], 4294961152  ;;  %v720_v0 = vld [vmem:[#allocation5 + $0x40] sm:$0xff]   ;;  %v724_v4 = vld [vmem:[#allocation5 + $0x48] sm:$0xff]   ;;  %s850_s11 = smov [#allocation7]  }
  0x27   :  { %v721_v1 = vld [vmem:[#allocation5] sm:$0xff]   ;;  %649 = vmatprep.subr.bf16.mxu0 %v720_v0  ;;  %v725_v5 = vld [vmem:[#allocation5 + $0x8] sm:$0xff]   ;;  %v728_v8 = vld [vmem:[#allocation5 + $0x50] sm:$0xff]   ;;  %s584_s12 = sshll.u32 %s850_s11, 4  ;;  %s585_s12 = int_to_ptr.vmem [resolvable:$true] %s584_s12 }
  0x28   :  { %v722_v2 = vld [vmem:[#allocation5 + $0xc0] sm:$0xff]   ;;  %650 = vmatpush3.bf16.msra.mxu0 %v721_v1  ;;  %v726_v6 = vld [vmem:[#allocation5 + $0xc8] sm:$0xff]   ;;  %v729_v9 = vld [vmem:[#allocation5 + $0x10] sm:$0xff]   ;;  %p823_p3 = scmp.lt.s32.totalorder %s585_s12, %s585_s12 }
  0x29   :  { %v723_v3 = vld [vmem:[#allocation5 + $0x80] sm:$0xff]   ;;  %671 = vmatprep.subr.bf16.mxu1 %v722_v2  ;;  %651 = vmatprep.subr.bf16.mxu0 %v724_v4  ;;  %v727_v7 = vld [vmem:[#allocation5 + $0x88] sm:$0xff]   ;;  %v730_v10 = vld [vmem:[#allocation5 + $0xd0] sm:$0xff]  }
  0x2a   :  { %672 = vmatpush3.bf16.msra.mxu1 %v723_v3  ;;  %v731_v11 = vld [vmem:[#allocation5 + $0x90] sm:$0xff]   ;;  %v732_v12 = vld [vmem:[#allocation5 + $0x58] sm:$0xff]   ;;  %v736_v16 = vld [vmem:[#allocation5 + $0x60] sm:$0xff]  }
  0x2b   :  { %673 = vmatprep.subr.bf16.mxu1 %v726_v6  ;;  %v733_v13 = vld [vmem:[#allocation5 + $0x18] sm:$0xff]   ;;  %v737_v17 = vld [vmem:[#allocation5 + $0x20] sm:$0xff]   ;;  %v740_v20 = vld [vmem:[#allocation5 + $0x68] sm:$0xff]  }
  0x2c   :  { %652 = vmatpush3.bf16.msra.mxu0 %v725_v5  ;;  %v734_v14 = vld [vmem:[#allocation5 + $0xd8] sm:$0xff]   ;;  %v738_v18 = vld [vmem:[#allocation5 + $0xe0] sm:$0xff]   ;;  %v741_v21 = vld [vmem:[#allocation5 + $0x28] sm:$0xff]  }
  0x2d   :  { %653 = vmatprep.subr.bf16.mxu0 %v728_v8  ;;  %v735_v15 = vld [vmem:[#allocation5 + $0x98] sm:$0xff]   ;;  %v739_v19 = vld [vmem:[#allocation5 + $0xa0] sm:$0xff]   ;;  %v742_v22 = vld [vmem:[#allocation5 + $0xe8] sm:$0xff]  }
  0x2e   :  { %674 = vmatpush3.bf16.msra.mxu1 %v727_v7  ;;  %v743_v23 = vld [vmem:[#allocation5 + $0xa8] sm:$0xff]   ;;  %v744_v24 = vld [vmem:[#allocation5 + $0x70] sm:$0xff]   ;;  %v748_v28 = vld [vmem:[#allocation5 + $0x78] sm:$0xff]  }
  0x2f   :  { %675 = vmatprep.subr.bf16.mxu1 %v730_v10  ;;  %v745_v25 = vld [vmem:[#allocation5 + $0x30] sm:$0xff]   ;;  %v749_v29 = vld [vmem:[#allocation5 + $0x38] sm:$0xff]   ;;  %v42_v31 = vld [vmem:[#allocation2] sm:$0xff] }
  0x30   :  { %654 = vmatpush3.bf16.msra.mxu0 %v729_v9  ;;  %v746_v26 = vld [vmem:[#allocation5 + $0xf0] sm:$0xff]   ;;  %v750_v30 = vld [vmem:[#allocation5 + $0xf8] sm:$0xff]   ;;  %v595_v32 = vcombine.low %v42_v31, %v42_v31  ;;  %v596_v33 = vcombine.high %v42_v31, %v42_v31  ;;  %v754_v35 = vld [vmem:[#allocation5 + $0x140] sm:$0xff]  }
  0x31   :  { %655 = vmatprep.subr.bf16.mxu0 %v732_v12  ;;  %v747_v27 = vld [vmem:[#allocation5 + $0xb0] sm:$0xff]   ;;  %v753_v34 = vld [vmem:[#allocation5 + $0xb8] sm:$0xff]   ;;  %v757_v39 = vld [vmem:[#allocation5 + $0x100] sm:$0xff]  }
  0x32   :  { %676 = vmatpush3.bf16.msra.mxu1 %v731_v11  ;;  %v43_v36 = vld [vmem:[#allocation2 + $0x8] sm:$0xff]  ;;  %489 = vmatprep.mubr.bf16.mxu0 %v596_v33  ;;  %v758_v40 = vld [vmem:[#allocation5 + $0x148] sm:$0xff]   ;;  %v762_v44 = vld [vmem:[#allocation5 + $0x158] sm:$0xff]  }
  0x33   :  { %677 = vmatprep.subr.bf16.mxu1 %v734_v14  ;;  %v597_v37 = vcombine.low %v43_v36, %v43_v36  ;;  %v598_v38 = vcombine.high %v43_v36, %v43_v36  ;;  %v759_v41 = vld [vmem:[#allocation5 + $0x108] sm:$0xff]   ;;  %v760_v42 = vld [vmem:[#allocation5 + $0x150] sm:$0xff]   ;;  %v763_v45 = vld [vmem:[#allocation5 + $0x118] sm:$0xff]  }
  0x34   :  { %656 = vmatpush3.bf16.msra.mxu0 %v733_v13  ;;  %v761_v43 = vld [vmem:[#allocation5 + $0x110] sm:$0xff]   ;;  %v764_v46 = vld [vmem:[#allocation5 + $0x160] sm:$0xff]   ;;  %v44_v48 = vld [vmem:[#allocation2 + $0x10] sm:$0xff] }
  0x35   :  { %657 = vmatprep.subr.bf16.mxu0 %v736_v16  ;;  %529 = vmatprep.mubr.bf16.mxu1 %v598_v38  ;;  %v765_v47 = vld [vmem:[#allocation5 + $0x120] sm:$0xff]   ;;  %v766_v49 = vld [vmem:[#allocation5 + $0x168] sm:$0xff]   ;;  %v600_v50 = vcombine.high %v44_v48, %v44_v48  ;;  %v768_v52 = vld [vmem:[#allocation5 + $0x170] sm:$0xff]   ;;  %v599_v56 = vcombine.low %v44_v48, %v44_v48 }
  0x36   :  { %678 = vmatpush3.bf16.msra.mxu1 %v735_v15  ;;  %v767_v51 = vld [vmem:[#allocation5 + $0x128] sm:$0xff]   ;;  %v769_v53 = vld [vmem:[#allocation5 + $0x130] sm:$0xff]   ;;  %v770_v54 = vld [vmem:[#allocation5 + $0x178] sm:$0xff]  }
  0x37   :  { %679 = vmatprep.subr.bf16.mxu1 %v738_v18  ;;  %v771_v55 = vld [vmem:[#allocation5 + $0x138] sm:$0xff]   ;;  %v594_v58 = vld [vmem:[%s919_s2] ss:$0 sm:$0xff]  ;;  %s818_s2 = scalar_lea.vmem %s585_s12, 128 }
  0x38   :  { %658 = vmatpush3.bf16.msra.mxu0 %v737_v17  ;;  %p819_p2 = scmp.ne.s32.totalorder %s585_s12, %s818_s2  ;;  %p824_p4 = scmp.lt.s32.totalorder %s818_s2, %s818_s2 }
  0x39   :  { %659 = vmatprep.subr.bf16.mxu0 %v740_v20 }
  0x3a   :  { %680 = vmatpush3.bf16.msra.mxu1 %v739_v19  ;;  %p825_p5 = por %p824_p4, %p823_p3 }
  0x3b   :  { %681 = vmatprep.subr.bf16.mxu1 %v742_v22 }
  0x3c   :  { %660 = vmatpush3.bf16.msra.mxu0 %v741_v21  ;;  %p826_p6 = pnand %p825_p5, %p819_p2 }
  0x3d   :  { %661 = vmatprep.subr.bf16.mxu0 %v744_v24 }
  0x3e   :  { %682 = vmatpush3.bf16.msra.mxu1 %v743_v23 }
  0x3f   :  { %683 = vmatprep.subr.bf16.mxu1 %v746_v26 }
  0x40   :  { %662 = vmatpush3.bf16.msra.mxu0 %v745_v25 }
  0x41   :  { %663 = vmatprep.subr.bf16.mxu0 %v748_v28 }
  0x42   :  { %684 = vmatpush3.bf16.msra.mxu1 %v747_v27 }
  0x43   :  { %685 = vmatprep.subr.bf16.mxu1 %v750_v30 }
  0x44   :  { %664 = vmatpush3.bf16.msra.mxu0 %v749_v29 }
  0x45   :  { %693 = vmatprep.subr.bf16.mxu0 %v754_v35 }
  0x46   :  { %686 = vmatpush3.bf16.msra.mxu1 %v753_v34 }
  0x47   :  { %490 = vmatmul.mubr.bf16.vlgmr.msra.gmra.mrb[0].mxu0 %v595_v32 }
  0x48   :  { %694 = vmatpush3.bf16.msra.mxu0 %v757_v39  ;;  %569 = vmatprep.mubr.bf16.mxu0 %v600_v50 }
  0x49   :  { %530 = vmatmul.mubr.bf16.vlgmr.msra.gmra.mrb[0].mxu1 %v597_v37  ;;  %695 = vmatprep.subr.bf16.mxu0 %v758_v40 }
  0x4c   :  { %696 = vmatpush3.bf16.msra.mxu0 %v759_v41 }
  0x4d   :  { %697 = vmatprep.subr.bf16.mxu0 %v760_v42 }
  0x50   :  { %698 = vmatpush3.bf16.msra.mxu0 %v761_v43 }
  0x51   :  { %699 = vmatprep.subr.bf16.mxu0 %v762_v44 }
  0x54   :  { %700 = vmatpush3.bf16.msra.mxu0 %v763_v45 }
  0x55   :  { %701 = vmatprep.subr.bf16.mxu0 %v764_v46 }
  0x58   :  { %702 = vmatpush3.bf16.msra.mxu0 %v765_v47 }
  0x59   :  { %703 = vmatprep.subr.bf16.mxu0 %v766_v49 }
  0x5c   :  { %704 = vmatpush3.bf16.msra.mxu0 %v767_v51 }
  0x5d   :  { %705 = vmatprep.subr.bf16.mxu0 %v768_v52 }
  0x60   :  { %706 = vmatpush3.bf16.msra.mxu0 %v769_v53 }
  0x61   :  { %707 = vmatprep.subr.bf16.mxu0 %v770_v54 }
  0x64   :  { %708 = vmatpush3.bf16.msra.mxu0 %v771_v55 }
  0x67   :  { %570 = vmatmul.mubr.bf16.vlgmr.msra.gmra.mrb[4].mxu0 %v599_v56 }
 0x11a   :  { %v665_v57 = vpop.f32.mrb[0].mxu0 }
 0x11b   :  { %v666_v59 = vpop.f32.mrb[1].mxu0 }
 0x11c   :  { %v667_v60 = vadd.f32 %v666_v59, %v665_v57  ;;  %v668_v61 = vpop.f32.mrb[2].mxu0  ;;  %v687_v62 = vpop.f32.mrb[0].mxu1 }
 0x11d   :  { %v669_v63 = vpop.f32.mrb[3].mxu0  ;;  %v688_v0 = vpop.f32.mrb[1].mxu1 }
 0x11e   :  { %v492_v1 = vadd.f32 %v667_v60, %v594_v58  ;;  %v689_v2 = vadd.f32 %v688_v0, %v687_v62  ;;  %v690_v3 = vpop.f32.mrb[2].mxu1 }
 0x11f   :  { %v691_v4 = vpop.f32.mrb[3].mxu1 }
 0x120   :  { %v532_v5 = vadd.f32 %v689_v2, %v492_v1 }
 0x13a   :  { %v709_v6 = vpop.f32.mrb[4].mxu0 }
 0x13b   :  { %v710_v7 = vpop.f32.mrb[5].mxu0 }
 0x13c   :  { %v711_v8 = vadd.f32 %v710_v7, %v709_v6  ;;  %v712_v9 = vpop.f32.mrb[6].mxu0 }
 0x13d   :  { %v713_v10 = vpop.f32.mrb[7].mxu0 }
 0x13e   :  { %v572_v11 = vadd.f32 %v711_v8, %v532_v5 }
 0x140   :  { %577 = vst [vmem:[#allocation7] sm:$0xff] %v572_v11 }
 0x141   :  { %829 = shalt.err (!%p826_p6)
}
 0x142   :  { %s830_s15 = scalar_lea.hbm %s920_s3, 128 }
 0x143   :  { %p831_p7 = scmp.ne.s32.totalorder %s920_s3, %s830_s15  ;;  %p834_p8 = scmp.lt.u32.totalorder %s830_s15, %s920_s3 }
 0x145   :  { %p836_p9 = pnand %p834_p8, %p831_p7 }
 0x147   :  { %839 = shalt.err (!%p836_p9)
}
 0x148   :  { %587 = dma.vmem_to_hbm [thread:$0]  %s585_s12, 128, %s920_s3, [#allocation4]  }
 0x149   :  { %844 = dma.done.wait [#allocation4], 128  }
 0x14a   :  { %845 = vsyncadd [#allocation4], 4294967168 }
 0x14b   :  { %591 = vsyncpa [#allocation3], 1 }
 0x14c   :  { %592 = vsyncpa [#allocation6], 1 }
 0x14d   :  { %593 = vsyncpa [#allocation4], 1 }

</bundles_post_ra>
